<compile_context>
chip_gen: v5e
topology: v5e:2x2
jax: 0.10.0
libtpu: 0.0.40
codegen_flags: <defaults>
</compile_context>

<pallas_src>
import math
import functools

import jax
import jax.numpy as jnp
from jax import lax
from jax.experimental import pallas as pl
from jax.experimental.pallas import tpu as pltpu


def _cast(x, dtype):
    """Cast only when needed (avoid no-op convert ops)."""
    return x if x.dtype == dtype else x.astype(dtype)


def _softmax_attn_kernel(z_ref, wqp_ref, gamma_ref, beta_ref, o_ref,
                         *, T, d, d_out, n_head, eps, mm_dtype):
    zf = z_ref[0]                      # (T, d) f32 — residual + score RHS source
    z_mm = _cast(zf, mm_dtype)         # matmul-operand copy (bf16 on v6e/v7x)
    wqp = wqp_ref[...]                 # (d, n_head*d + n_head*d_out) resident

    # One fused 256-lane-wide MXU pass for all per-head Q and P projections
    # (1/sqrt(d) and 1/n_head already folded into the weights).
    #   proj[:, h*d:(h+1)*d]                          == Z @ (Q[h]/sqrt(d)).T
    #   proj[:, H*d + h*d_out : H*d + (h+1)*d_out]    == Z @ (P[h]/n_head).T
    proj = jnp.dot(z_mm, wqp, preferred_element_type=jnp.float32)  # (T, 256)
    q_off = 0
    p_off = n_head * d

    # Causal mask, hoisted out of the head loop.
    row = lax.broadcasted_iota(jnp.int32, (T, T), 0)
    col = lax.broadcasted_iota(jnp.int32, (T, T), 1)
    causal = row >= col

    # Heads fused into this single grid step: static unrolled loop, local f32
    # accumulator (no VMEM scratch round-trips, no pl.when phases).
    acc = jnp.zeros((T, d_out), jnp.float32)
    for h in range(n_head):
        qz_h = proj[:, q_off + h * d: q_off + (h + 1) * d]           # (T, d)
        pz_h = proj[:, p_off + h * d_out: p_off + (h + 1) * d_out]   # (T, d_out)

        # scores = (Z (Q_h/sqrt(d))^T) Z^T  -> (T, T), f32 accumulation.
        s = lax.dot_general(_cast(qz_h, mm_dtype), z_mm,
                            (((1,), (1,)), ((), ())),
                            preferred_element_type=jnp.float32)
        s = jnp.where(causal, s, -jnp.inf)
        s = s - jnp.max(s, axis=-1, keepdims=True)
        e = jnp.exp(s)
        # EUP approx reciprocal instead of a VPU-heavy f32 divide.
        p = e * pl.reciprocal(jnp.sum(e, axis=-1, keepdims=True), approx=True)

        acc = acc + jnp.dot(_cast(p, mm_dtype), _cast(pz_h, mm_dtype),
                            preferred_element_type=jnp.float32)

    # acc already carries the 1/n_head head-mean factor. Residual + LayerNorm.
    y = acc + zf                                   # (T, d_out), d_out == d
    mu = jnp.mean(y, axis=-1, keepdims=True)
    yc = y - mu
    var = jnp.mean(yc * yc, axis=-1, keepdims=True)
    out = yc * lax.rsqrt(var + eps)
    out = out * gamma_ref[...] + beta_ref[...]
    o_ref[0] = out.astype(o_ref.dtype)


def softmax_attention_forward(x, P, Q, ln_gamma, ln_beta, *,
                              eps=1e-5, matmul_dtype=jnp.bfloat16):
    """x: (B, T, d); P: (n_head, d_out, d); Q: (n_head, d, d).

    matmul_dtype: dtype of MXU operands (bf16 recommended on v6e/v7x);
    softmax / LayerNorm / accumulation always run in f32.
    """
    B, T, d = x.shape
    n_head, d_out, _ = P.shape
    assert d_out == d, "this configuration requires d_out == d for the residual"

    # Fuse per-head weights into one lane-dense (d, n_head*(d + d_out)) matrix,
    # folding the 1/sqrt(d) score scale into Q and the 1/n_head head-mean into P:
    #   (Z @ W_q)[:, h*d + j]     == (Z @ Q[h].T)[:, j] / sqrt(d)
    #   (Z @ W_p)[:, h*d_out + j] == (Z @ P[h].T)[:, j] / n_head
    W_q = jnp.transpose(Q, (2, 0, 1)).reshape(d, n_head * d) * (1.0 / math.sqrt(d))
    W_p = jnp.transpose(P, (2, 0, 1)).reshape(d, n_head * d_out) * (1.0 / n_head)
    W_qp = jnp.concatenate([W_q, W_p], axis=1).astype(matmul_dtype)  # (d, 256)

    gamma2 = ln_gamma.reshape(1, d_out)
    beta2 = ln_beta.reshape(1, d_out)

    kernel = functools.partial(_softmax_attn_kernel, T=T, d=d, d_out=d_out,
                               n_head=n_head, eps=eps, mm_dtype=matmul_dtype)

    return pl.pallas_call(
        kernel,
        out_shape=jax.ShapeDtypeStruct((B, T, d_out), x.dtype),
        grid_spec=pltpu.PrefetchScalarGridSpec(
            num_scalar_prefetch=0,
            grid=(B,),                                                 # one step per batch
            in_specs=[
                pl.BlockSpec((1, T, d), lambda b: (b, 0, 0)),          # Z (per batch)
                pl.BlockSpec((d, n_head * (d + d_out)),
                             lambda b: (0, 0)),                        # fused W_qp, resident
                pl.BlockSpec((1, d_out), lambda b: (0, 0)),            # LN gamma
                pl.BlockSpec((1, d_out), lambda b: (0, 0)),            # LN beta
            ],
            out_specs=pl.BlockSpec((1, T, d_out), lambda b: (b, 0, 0)),
        ),
        compiler_params=pltpu.CompilerParams(
            dimension_semantics=("parallel",)),                        # batch -> 2 TCs on v7x
    )(x, W_qp, gamma2, beta2)


def _reference(x, P, Q, gamma, beta, eps=1e-5):
    """Pure-JAX reference mirroring the PyTorch forward exactly (f32)."""
    B, T, d = x.shape
    m, d_out, _ = P.shape
    qz = jnp.einsum("btd,mkd->bmtk", x, Q)                 # (B, m, T, d)
    pz = jnp.einsum("btd,mod->bmto", x, P)                 # (B, m, T, d_out)
    scores = jnp.einsum("bmtk,bsk->bmts", qz, x) / math.sqrt(d)
    mask = jnp.tril(jnp.ones((T, T)))
    scores = jnp.where(mask == 0, -jnp.inf, scores)
    probs = jax.nn.softmax(scores, axis=-1)
    out = jnp.einsum("bmts,bmso->bmto", probs, pz)
    y = out.mean(axis=1)                                   # mean over heads
    xln = y + x                                            # residual
    mu = xln.mean(-1, keepdims=True)
    var = ((xln - mu) ** 2).mean(-1, keepdims=True)
    return (xln - mu) / jnp.sqrt(var + eps) * gamma + beta


if __name__ == "__main__":
    B, T, d, d_out, n_head = 2, 8, 32, 32, 4
    winit = 1.0

    key = jax.random.PRNGKey(0)
    k_p, k_q, k_x = jax.random.split(key, 3)

    # Deterministic parameter init mirroring the PyTorch __init__:
    #   P ~ randn(n_head, d_out, d) * winit / sqrt(d)
    #   Q ~ randn(n_head, d, d)     * winit / sqrt(d)
    #   LayerNorm: weight = 1, bias = 0 (PyTorch defaults)
    P = jax.random.normal(k_p, (n_head, d_out, d), jnp.float32) * winit / math.sqrt(d)
    Q = jax.random.normal(k_q, (n_head, d, d), jnp.float32) * winit / math.sqrt(d)
    ln_gamma = jnp.ones((d_out,), jnp.float32)
    ln_beta = jnp.zeros((d_out,), jnp.float32)

    x = jax.random.normal(k_x, (B, T, d), jnp.float32)

    ref = _reference(x, P, Q, ln_gamma, ln_beta)

    # f32 MXU-operand path (exact semantics; only approx-reciprocal deviates).
    out_f32 = jax.block_until_ready(
        softmax_attention_forward(x, P, Q, ln_gamma, ln_beta,
                                  matmul_dtype=jnp.float32))
    assert out_f32.shape == (B, T, d_out)
    err_f32 = jnp.max(jnp.abs(out_f32 - ref))
    assert jnp.allclose(out_f32, ref, atol=5e-3, rtol=5e-3), (
        f"f32 path max abs err {err_f32}")

    # bf16 MXU-operand path (v6e/v7x native); softmax/LayerNorm stay f32.
    out_bf16 = jax.block_until_ready(
        softmax_attention_forward(x, P, Q, ln_gamma, ln_beta,
                                  matmul_dtype=jnp.bfloat16))
    assert out_bf16.shape == (B, T, d_out)
    err_bf16 = jnp.max(jnp.abs(out_bf16 - ref))
    assert jnp.allclose(out_bf16, ref, atol=5e-2, rtol=5e-2), (
        f"bf16 path max abs err {err_bf16}")

    # TODO(synk): mlp / have_output_proj / have_key_proj branches are disabled
    # in this instantiation (all False), matching the chosen module config.
    print("KERNEL_OK")
</pallas_src>

<mosaic_0001>
module attributes {stable_mosaic.version = 11 : i64} {
  func.func @_softmax_attn_kernel(%arg0: i32, %arg1: memref<1x8x32xf32, #tpu.memory_space<vmem>>, %arg2: memref<32x256xf32, #tpu.memory_space<vmem>>, %arg3: memref<1x32xf32, #tpu.memory_space<vmem>>, %arg4: memref<1x32xf32, #tpu.memory_space<vmem>>, %arg5: memref<1x8x32xf32, #tpu.memory_space<vmem>>) attributes {dimension_semantics = [#tpu.dimension_semantics<parallel>], iteration_bounds = array<i64: 2>, scalar_prefetch = 0 : i64, scratch_operands = 0 : i64, tpu.core_type = #tpu.core_type<tc>, window_params = [{transform_indices = @transform_0, window_bounds = array<i64: 1, 8, 32>}, {pipeline_mode = #tpu.pipeline_mode<synchronous>, transform_indices = @transform_1, window_bounds = array<i64: 32, 256>}, {pipeline_mode = #tpu.pipeline_mode<synchronous>, transform_indices = @transform_2, window_bounds = array<i64: 1, 32>}, {pipeline_mode = #tpu.pipeline_mode<synchronous>, transform_indices = @transform_3, window_bounds = array<i64: 1, 32>}, {transform_indices = @transform_4, window_bounds = array<i64: 1, 8, 32>}]} {
    %c0 = arith.constant 0 : index
    %c0_0 = arith.constant 0 : index
    %c0_1 = arith.constant 0 : index
    %0 = vector.load %arg1[%c0, %c0_0, %c0_1] : memref<1x8x32xf32, #tpu.memory_space<vmem>>, vector<1x8x32xf32>
    %1 = vector.shape_cast %0 : vector<1x8x32xf32> to vector<8x32xf32>
    %c0_2 = arith.constant 0 : index
    %c0_3 = arith.constant 0 : index
    %2 = vector.load %arg2[%c0_2, %c0_3] : memref<32x256xf32, #tpu.memory_space<vmem>>, vector<32x256xf32>
    %cst = arith.constant dense<0.000000e+00> : vector<8x256xf32>
    %3 = tpu.matmul %1, %2, %cst {dimension_numbers = #tpu.dot_dimension_numbers<[1], [0], [0], [1], [0, 0, 1, 1], [], []>} : vector<8x32xf32>, vector<32x256xf32>, vector<8x256xf32> -> vector<8x256xf32>
    %4 = tpu.iota {dimensions = array<i32: 0>} : vector<8x8xi32>
    %5 = tpu.iota {dimensions = array<i32: 1>} : vector<8x8xi32>
    %6 = arith.cmpi sge, %4, %5 : vector<8x8xi32>
    %cst_4 = arith.constant 0.000000e+00 : f32
    %7 = vector.broadcast %cst_4 : f32 to vector<8x32xf32>
    %8 = vector.extract_strided_slice %3 {offsets = [0, 0], sizes = [8, 32], strides = [1, 1]} : vector<8x256xf32> to vector<8x32xf32>
    %9 = vector.extract_strided_slice %3 {offsets = [0, 128], sizes = [8, 32], strides = [1, 1]} : vector<8x256xf32> to vector<8x32xf32>
    %cst_5 = arith.constant dense<0.000000e+00> : vector<8x8xf32>
    %10 = tpu.matmul %8, %1, %cst_5 {dimension_numbers = #tpu.dot_dimension_numbers<[1], [1], [0], [0], [0, 0, 1, 0], [], []>} : vector<8x32xf32>, vector<8x32xf32>, vector<8x8xf32> -> vector<8x8xf32>
    %cst_6 = arith.constant 0xFF800000 : f32
    %11 = vector.broadcast %cst_6 : f32 to vector<8x8xf32>
    %12 = arith.select %6, %10, %11 : vector<8x8xi1>, vector<8x8xf32>
    %cst_7 = arith.constant dense<0xFF800000> : vector<8xf32>
    %13 = vector.multi_reduction <maximumf>, %12, %cst_7 [1] : vector<8x8xf32> to vector<8xf32>
    %14 = vector.shape_cast %13 : vector<8xf32> to vector<8x1xf32>
    %15 = vector.broadcast %14 : vector<8x1xf32> to vector<8x8xf32>
    %16 = arith.subf %12, %15 : vector<8x8xf32>
    %17 = math.exp %16 : vector<8x8xf32>
    %cst_8 = arith.constant dense<0.000000e+00> : vector<8xf32>
    %18 = vector.multi_reduction <add>, %17, %cst_8 [1] : vector<8x8xf32> to vector<8xf32>
    %19 = vector.shape_cast %18 : vector<8xf32> to vector<8x1xf32>
    %20 = tpu.reciprocal %19 {approx = true} : vector<8x1xf32> -> vector<8x1xf32>
    %21 = vector.broadcast %20 : vector<8x1xf32> to vector<8x8xf32>
    %22 = arith.mulf %17, %21 : vector<8x8xf32>
    %cst_9 = arith.constant dense<0.000000e+00> : vector<8x32xf32>
    %23 = tpu.matmul %22, %9, %cst_9 {dimension_numbers = #tpu.dot_dimension_numbers<[1], [0], [0], [1], [0, 0, 1, 1], [], []>} : vector<8x8xf32>, vector<8x32xf32>, vector<8x32xf32> -> vector<8x32xf32>
    %24 = arith.addf %7, %23 : vector<8x32xf32>
    %25 = vector.extract_strided_slice %3 {offsets = [0, 32], sizes = [8, 32], strides = [1, 1]} : vector<8x256xf32> to vector<8x32xf32>
    %26 = vector.extract_strided_slice %3 {offsets = [0, 160], sizes = [8, 32], strides = [1, 1]} : vector<8x256xf32> to vector<8x32xf32>
    %cst_10 = arith.constant dense<0.000000e+00> : vector<8x8xf32>
    %27 = tpu.matmul %25, %1, %cst_10 {dimension_numbers = #tpu.dot_dimension_numbers<[1], [1], [0], [0], [0, 0, 1, 0], [], []>} : vector<8x32xf32>, vector<8x32xf32>, vector<8x8xf32> -> vector<8x8xf32>
    %cst_11 = arith.constant 0xFF800000 : f32
    %28 = vector.broadcast %cst_11 : f32 to vector<8x8xf32>
    %29 = arith.select %6, %27, %28 : vector<8x8xi1>, vector<8x8xf32>
    %cst_12 = arith.constant dense<0xFF800000> : vector<8xf32>
    %30 = vector.multi_reduction <maximumf>, %29, %cst_12 [1] : vector<8x8xf32> to vector<8xf32>
    %31 = vector.shape_cast %30 : vector<8xf32> to vector<8x1xf32>
    %32 = vector.broadcast %31 : vector<8x1xf32> to vector<8x8xf32>
    %33 = arith.subf %29, %32 : vector<8x8xf32>
    %34 = math.exp %33 : vector<8x8xf32>
    %cst_13 = arith.constant dense<0.000000e+00> : vector<8xf32>
    %35 = vector.multi_reduction <add>, %34, %cst_13 [1] : vector<8x8xf32> to vector<8xf32>
    %36 = vector.shape_cast %35 : vector<8xf32> to vector<8x1xf32>
    %37 = tpu.reciprocal %36 {approx = true} : vector<8x1xf32> -> vector<8x1xf32>
    %38 = vector.broadcast %37 : vector<8x1xf32> to vector<8x8xf32>
    %39 = arith.mulf %34, %38 : vector<8x8xf32>
    %cst_14 = arith.constant dense<0.000000e+00> : vector<8x32xf32>
    %40 = tpu.matmul %39, %26, %cst_14 {dimension_numbers = #tpu.dot_dimension_numbers<[1], [0], [0], [1], [0, 0, 1, 1], [], []>} : vector<8x8xf32>, vector<8x32xf32>, vector<8x32xf32> -> vector<8x32xf32>
    %41 = arith.addf %24, %40 : vector<8x32xf32>
    %42 = vector.extract_strided_slice %3 {offsets = [0, 64], sizes = [8, 32], strides = [1, 1]} : vector<8x256xf32> to vector<8x32xf32>
    %43 = vector.extract_strided_slice %3 {offsets = [0, 192], sizes = [8, 32], strides = [1, 1]} : vector<8x256xf32> to vector<8x32xf32>
    %cst_15 = arith.constant dense<0.000000e+00> : vector<8x8xf32>
    %44 = tpu.matmul %42, %1, %cst_15 {dimension_numbers = #tpu.dot_dimension_numbers<[1], [1], [0], [0], [0, 0, 1, 0], [], []>} : vector<8x32xf32>, vector<8x32xf32>, vector<8x8xf32> -> vector<8x8xf32>
    %cst_16 = arith.constant 0xFF800000 : f32
    %45 = vector.broadcast %cst_16 : f32 to vector<8x8xf32>
    %46 = arith.select %6, %44, %45 : vector<8x8xi1>, vector<8x8xf32>
    %cst_17 = arith.constant dense<0xFF800000> : vector<8xf32>
    %47 = vector.multi_reduction <maximumf>, %46, %cst_17 [1] : vector<8x8xf32> to vector<8xf32>
    %48 = vector.shape_cast %47 : vector<8xf32> to vector<8x1xf32>
    %49 = vector.broadcast %48 : vector<8x1xf32> to vector<8x8xf32>
    %50 = arith.subf %46, %49 : vector<8x8xf32>
    %51 = math.exp %50 : vector<8x8xf32>
    %cst_18 = arith.constant dense<0.000000e+00> : vector<8xf32>
    %52 = vector.multi_reduction <add>, %51, %cst_18 [1] : vector<8x8xf32> to vector<8xf32>
    %53 = vector.shape_cast %52 : vector<8xf32> to vector<8x1xf32>
    %54 = tpu.reciprocal %53 {approx = true} : vector<8x1xf32> -> vector<8x1xf32>
    %55 = vector.broadcast %54 : vector<8x1xf32> to vector<8x8xf32>
    %56 = arith.mulf %51, %55 : vector<8x8xf32>
    %cst_19 = arith.constant dense<0.000000e+00> : vector<8x32xf32>
    %57 = tpu.matmul %56, %43, %cst_19 {dimension_numbers = #tpu.dot_dimension_numbers<[1], [0], [0], [1], [0, 0, 1, 1], [], []>} : vector<8x8xf32>, vector<8x32xf32>, vector<8x32xf32> -> vector<8x32xf32>
    %58 = arith.addf %41, %57 : vector<8x32xf32>
    %59 = vector.extract_strided_slice %3 {offsets = [0, 96], sizes = [8, 32], strides = [1, 1]} : vector<8x256xf32> to vector<8x32xf32>
    %60 = vector.extract_strided_slice %3 {offsets = [0, 224], sizes = [8, 32], strides = [1, 1]} : vector<8x256xf32> to vector<8x32xf32>
    %cst_20 = arith.constant dense<0.000000e+00> : vector<8x8xf32>
    %61 = tpu.matmul %59, %1, %cst_20 {dimension_numbers = #tpu.dot_dimension_numbers<[1], [1], [0], [0], [0, 0, 1, 0], [], []>} : vector<8x32xf32>, vector<8x32xf32>, vector<8x8xf32> -> vector<8x8xf32>
    %cst_21 = arith.constant 0xFF800000 : f32
    %62 = vector.broadcast %cst_21 : f32 to vector<8x8xf32>
    %63 = arith.select %6, %61, %62 : vector<8x8xi1>, vector<8x8xf32>
    %cst_22 = arith.constant dense<0xFF800000> : vector<8xf32>
    %64 = vector.multi_reduction <maximumf>, %63, %cst_22 [1] : vector<8x8xf32> to vector<8xf32>
    %65 = vector.shape_cast %64 : vector<8xf32> to vector<8x1xf32>
    %66 = vector.broadcast %65 : vector<8x1xf32> to vector<8x8xf32>
    %67 = arith.subf %63, %66 : vector<8x8xf32>
    %68 = math.exp %67 : vector<8x8xf32>
    %cst_23 = arith.constant dense<0.000000e+00> : vector<8xf32>
    %69 = vector.multi_reduction <add>, %68, %cst_23 [1] : vector<8x8xf32> to vector<8xf32>
    %70 = vector.shape_cast %69 : vector<8xf32> to vector<8x1xf32>
    %71 = tpu.reciprocal %70 {approx = true} : vector<8x1xf32> -> vector<8x1xf32>
    %72 = vector.broadcast %71 : vector<8x1xf32> to vector<8x8xf32>
    %73 = arith.mulf %68, %72 : vector<8x8xf32>
    %cst_24 = arith.constant dense<0.000000e+00> : vector<8x32xf32>
    %74 = tpu.matmul %73, %60, %cst_24 {dimension_numbers = #tpu.dot_dimension_numbers<[1], [0], [0], [1], [0, 0, 1, 1], [], []>} : vector<8x8xf32>, vector<8x32xf32>, vector<8x32xf32> -> vector<8x32xf32>
    %75 = arith.addf %58, %74 : vector<8x32xf32>
    %76 = arith.addf %75, %1 : vector<8x32xf32>
    %cst_25 = arith.constant dense<0.000000e+00> : vector<8xf32>
    %77 = vector.multi_reduction <add>, %76, %cst_25 [1] : vector<8x32xf32> to vector<8xf32>
    %78 = vector.shape_cast %77 : vector<8xf32> to vector<8x1xf32>
    %cst_26 = arith.constant 3.200000e+01 : f32
    %79 = vector.broadcast %cst_26 : f32 to vector<8x1xf32>
    %80 = arith.divf %78, %79 : vector<8x1xf32>
    %81 = vector.broadcast %80 : vector<8x1xf32> to vector<8x32xf32>
    %82 = arith.subf %76, %81 : vector<8x32xf32>
    %83 = arith.mulf %82, %82 : vector<8x32xf32>
    %cst_27 = arith.constant dense<0.000000e+00> : vector<8xf32>
    %84 = vector.multi_reduction <add>, %83, %cst_27 [1] : vector<8x32xf32> to vector<8xf32>
    %85 = vector.shape_cast %84 : vector<8xf32> to vector<8x1xf32>
    %cst_28 = arith.constant 3.200000e+01 : f32
    %86 = vector.broadcast %cst_28 : f32 to vector<8x1xf32>
    %87 = arith.divf %85, %86 : vector<8x1xf32>
    %cst_29 = arith.constant 9.99999974E-6 : f32
    %88 = vector.broadcast %cst_29 : f32 to vector<8x1xf32>
    %89 = arith.addf %87, %88 : vector<8x1xf32>
    %90 = math.rsqrt %89 : vector<8x1xf32>
    %91 = vector.broadcast %90 : vector<8x1xf32> to vector<8x32xf32>
    %92 = arith.mulf %82, %91 : vector<8x32xf32>
    %c0_30 = arith.constant 0 : index
    %c0_31 = arith.constant 0 : index
    %93 = vector.load %arg3[%c0_30, %c0_31] : memref<1x32xf32, #tpu.memory_space<vmem>>, vector<1x32xf32>
    %94 = vector.broadcast %93 : vector<1x32xf32> to vector<8x32xf32>
    %95 = arith.mulf %92, %94 : vector<8x32xf32>
    %c0_32 = arith.constant 0 : index
    %c0_33 = arith.constant 0 : index
    %96 = vector.load %arg4[%c0_32, %c0_33] : memref<1x32xf32, #tpu.memory_space<vmem>>, vector<1x32xf32>
    %97 = vector.broadcast %96 : vector<1x32xf32> to vector<8x32xf32>
    %98 = arith.addf %95, %97 : vector<8x32xf32>
    %c0_34 = arith.constant 0 : index
    %c0_35 = arith.constant 0 : index
    %c0_36 = arith.constant 0 : index
    %99 = vector.load %arg5[%c0_34, %c0_35, %c0_36] : memref<1x8x32xf32, #tpu.memory_space<vmem>>, vector<1x8x32xf32>
    %100 = vector.shape_cast %99 : vector<1x8x32xf32> to vector<8x32xf32>
    %101 = vector.shape_cast %98 : vector<8x32xf32> to vector<1x8x32xf32>
    tpu.vector_store %arg5[%c0_34, %c0_35, %c0_36], %101 {strides = array<i32>} : memref<1x8x32xf32, #tpu.memory_space<vmem>>, vector<1x8x32xf32>,
    return
  }
  func.func @transform_0(%arg0: i32) -> (i32, i32, i32) {
    %c0_i32 = arith.constant 0 : i32
    %c0_i32_0 = arith.constant 0 : i32
    %c0_i32_1 = arith.constant 0 : i32
    return %arg0, %c0_i32, %c0_i32_0 : i32, i32, i32
  }
  func.func @transform_1(%arg0: i32) -> (i32, i32) {
    %c0_i32 = arith.constant 0 : i32
    %c0_i32_0 = arith.constant 0 : i32
    %c0_i32_1 = arith.constant 0 : i32
    return %c0_i32, %c0_i32_0 : i32, i32
  }
  func.func @transform_2(%arg0: i32) -> (i32, i32) {
    %c0_i32 = arith.constant 0 : i32
    %c0_i32_0 = arith.constant 0 : i32
    %c0_i32_1 = arith.constant 0 : i32
    return %c0_i32, %c0_i32_0 : i32, i32
  }
  func.func @transform_3(%arg0: i32) -> (i32, i32) {
    %c0_i32 = arith.constant 0 : i32
    %c0_i32_0 = arith.constant 0 : i32
    %c0_i32_1 = arith.constant 0 : i32
    return %c0_i32, %c0_i32_0 : i32, i32
  }
  func.func @transform_4(%arg0: i32) -> (i32, i32, i32) {
    %c0_i32 = arith.constant 0 : i32
    %c0_i32_0 = arith.constant 0 : i32
    %c0_i32_1 = arith.constant 0 : i32
    return %arg0, %c0_i32, %c0_i32_0 : i32, i32, i32
  }
}

</mosaic_0001>

<bundles_post_ra>
// kernel: tpu_custom_call.1
= control target key start
LH: loop header
LB: loop body
LE: loop exit
PB: predicated region body
PF: predicated region fallthrough
CT: control target
= control target key end

     0   :  { %9 = vsyncpa [#allocation3], 0  ;;  %s1159_s0 = inlined_call_operand.hbm [shape: f32[2,8,32], index: 0, kind: input, shape index: {}]   ;;  %s1160_s1 = inlined_call_operand.hbm [shape: f32[32,256], index: 1, kind: input, shape index: {}]   ;;  %s1161_s2 = inlined_call_operand.vmem [shape: f32[1,32], index: 2, kind: input, shape index: {}]   ;;  %s1162_s3 = inlined_call_operand.vmem [shape: f32[1,32], index: 3, kind: input, shape index: {}]   ;;  %s1163_s4 = inlined_call_operand.hbm [shape: f32[2,8,32], index: 4, kind: output, shape index: {}]  }
   0x1   :  { %11 = vsyncpa [#allocation3 + $0x1], 0 }
   0x2   :  { %12 = vsyncpa [#allocation6], 0 }
   0x3   :  { %13 = vsyncpa [#allocation4], 0 }
   0x4   :  { %15 = vsyncpa [#allocation4 + $0x1], 0  ;;  %s952_s15 = smov 0   ;;  %s954_s16 = smov 0  }
   0x5   :  { %s956_s17 = smov 0   ;;  %s958_s18 = smov 0  }
   0x6 LB: > { %s152_s21 = sshll.u32 %s1160_s1, 4  ;;  %s976_s22 = sadd.s32 4294967295, %s918_s18   ;;  %s918_s18 = sphi %s958_s18, %s1173_s18   ;;  %s914_s17 = sphi %s956_s17, %s1172_s17   ;;  %s910_s16 = sphi %s954_s16, %s1171_s16   ;;  %s906_s15 = sphi %s952_s15, %s1170_s15   ;;  %s153_s21 = int_to_ptr.hbm [resolvable:$true] %s152_s21 }
   0x7   : > { %p676_p0 = scmp.ge.s32.totalorder %s918_s18, 1  ;;  %p42_p1 = scmp.eq.s32.totalorder %s976_s22, 0 }
   0x8   : > { %p141_p2 = scmp.lt.s32.totalorder %s918_s18, 3  ;;  %s920_s24 = smov [#allocation5]  }
   0x9   : > { %s154_s25 = sshll.u32 %s920_s24, 4  ;;  %s921_s26 = smov 256   ;;  %s155_s25 = int_to_ptr.vmem [resolvable:$true] %s154_s25 }
   0xa   : > { %p981_p3 = pnand %p676_p0, %p141_p2  ;;  %s922_s27 = smov 16  }
   0xb   : > { %s675_s28 = sadd.s32 4294967294, %s918_s18   ;;  %s992_s29 = sadd.s32 1, %s918_s18  }
   0xc   : > { %p711_p4 = pneg %p981_p3  ;;  %s28_s30 = sadd.s32 1, %s914_s17 }
   0xd   : > { %s25_s5 = ssub.s32 %s918_s18, %s992_s29  ;;  %p35_p7 = scmp.ne.s32.totalorder %s914_s17, %s910_s16 }
   0xe   : > { %p712_p6 = pnand %p711_p4, %p42_p1  ;;  %p26_p8 = scmp.eq.s32.totalorder %s25_s5, 0 }
   0xf   : > { %p36_p9 = scmp.eq.s32.totalorder %s918_s18, 0  ;;  %p41_p10 = scmp.ne.s32.totalorder %s910_s16, %s906_s15 }
  0x10   : > { %714 = dma.hbm_to_vmem [thread:$0]  (!%p712_p6), %s153_s21, 1024, %s155_s25, [#allocation6], %s921_s26, %s921_s26, %s922_s27  }
  0x11   : > { %p128_p11 = scmp.eq.s32.totalorder %s976_s22, 1  ;;  %p1008_p12 = por %p42_p1, %p41_p10 }
  0x12   : > { %s1004_s6 = scalar_select %p26_p8, %s914_s17, %s28_s30  }
  0x13   : > { %p1012_p13 = por %p128_p11, %p35_p7  ;;  %p134_p0 = scmp.eq.s32.totalorder %s675_s28, 1 }
  0x14   : > { %p37_p2 = por %p36_p9, %p35_p7  ;;  %s174_s9 = sand.u32 1, %s914_s17  }
  0x15   : > { %p1017_p4 = por %p134_p0, %p41_p10  ;;  %p724_p6 = scmp.lt.s32.totalorder %s918_s18, 2 }
  0x16   : > { %s679_s11 = sshll.u32 %s174_s9, 3  ;;  %s680_s12 = sshll.u32 %s918_s18, 3 }
  0x17   : > { %s182_s19 = scalar_lea.hbm %s1159_s0, %s680_s12  ;;  %s178_s21 = scalar_lea.vmem [#allocation2], %s679_s11 }
  0x18   : > { %s184_s20 = sshll.u32 %s182_s19, 4  ;;  %s186_s24 = sshll.u32 %s178_s21, 4  ;;  %s185_s20 = int_to_ptr.hbm [resolvable:$true] %s184_s20  ;;  %s187_s24 = int_to_ptr.vmem [resolvable:$true] %s186_s24 }
  0x19   : > { %p1026_p8 = pnand %p724_p6, %p37_p2  ;;  %s175_s26 = scalar_lea.sflag [#allocation3], %s174_s9 }
  0x1a   : > { %s818_s27 = sshra.s32 %s185_s20, 4  ;;  %s825_s11 = scalar_lea.hbm %s1159_s0, 16  ;;  %s819_s27 = int_to_ptr.hbm [resolvable:$true] %s818_s27 }
  0x1b   : > { %s820_s28 = scalar_lea.hbm %s819_s27, 8  ;;  %p822_p9 = pneg %p1026_p8 }
  0x1c   : > { %p821_p7 = scmp.ne.s32.totalorder %s819_s27, %s820_s28  ;;  %p826_p0 = scmp.lt.s32.totalorder %s819_s27, %s1159_s0 }
  0x1d   : > { %p827_p2 = scmp.lt.s32.totalorder %s825_s11, %s820_s28 }
  0x1e   : > { %p823_p10 = pnand %p822_p9, %p821_p7 }
  0x1f   : > { %p828_p6 = por %p827_p2, %p826_p0 }
  0x20   : > { %p824_p11 = pneg %p823_p10 }
  0x22   : > { %p829_p5 = pnand %p828_p6, %p824_p11 }
  0x24   : > { %832 = shalt.err (!%p829_p5)
}
  0x25   : > { %718 = dma.hbm_to_vmem [thread:$0]  (!%p1026_p8), %s185_s20, 128, %s187_s24, %s175_s26  }
  0x26   : > { %195 = sbr.rel (%p981_p3) target bundleno = 1511 (0x5e7), region = 36  ;;  %s1043_s9 = sand.u32 (!%p981_p3), 1, %s910_s16  }
  0x27   : > { %s682_s14 = sshll.u32 (!%p981_p3), %s1043_s9, 3  ;;  %s198_s19 = scalar_lea.sflag (!%p981_p3), [#allocation3], %s1043_s9 }
  0x28   : > { %s201_s21 = scalar_lea.vmem (!%p981_p3), [#allocation2], %s682_s14 }
  0x2b   : > { %893 = dma.done.wait (%p1008_p12), %s198_s19, 128  }
  0x2c   : > { %895 = vsyncadd (%p1008_p12), %s198_s19, 4294967168 }
  0x2d   : > { %897 = dma.done.wait (%p42_p1), [#allocation6], 1024  }
  0x2e   : > { %899 = vsyncadd (%p42_p1), [#allocation6], 4294966272  ;;  %v239_v0 = vld [vmem:[#allocation5 + $0x30] sm:$0xff]  ;;  %v237_v1 = vld [vmem:[#allocation5 + $0x20] sm:$0xff]  ;;  %vm241_vm0 = vcmask 261120   ;;  %s923_s23 = smov 32   ;;  %v285_v9 = vlaneseq }
  0x2f   : > { %257 = vmatpush.msra.mxu0 %v239_v0  ;;  %v1057_v2 = vld [vmem:[%s201_s21] sm:$0xff]  ;;  %v233_v4 = vld [vmem:[#allocation5] sm:$0xff]  ;;  %s924_s7 = smov 96   ;;  %s925_s20 = smov 64   ;;  %vm314_vm2 = vcmask 64512   ;;  %v238_v16 = vld [vmem:[#allocation5 + $0x28] sm:$0xff] }
  0x30   : > { %v235_v3 = vld [vmem:[#allocation5 + $0x10] sm:$0xff]  ;;  %687 = vmatpush.xpose.msk.msra.mxu2 %vm241_vm0, %v1057_v2  ;;  %689 = vmatpush.xpose.msk.msra.mxu3 %vm241_vm0, %v1057_v2  ;;  %v1075_v10 = vshrl.u32 %v285_v9, 7  ;;  %v1077_v11 = vand.u32 127, %v285_v9  ;;  %v240_v15 = vld [vmem:[#allocation5 + $0x38] sm:$0xff]  ;;  %v234_v18 = vld [vmem:[#allocation5 + $0x8] sm:$0xff]  ;;  %s700_s24 = sshll.u32 %s976_s22, 3 }
  0x31   : > { %258 = vmatpush.msra.mxu0 %v237_v1  ;;  %277 = vmatpush.msra.mxu1 %v240_v15  ;;  %v236_v17 = vld [vmem:[#allocation5 + $0x18] sm:$0xff]  ;;  %s590_s30 = scalar_lea.hbm %s1163_s4, %s700_s24  ;;  %s231_s22 = scalar_lea.vmem [#allocation7], %s682_s14 }
  0x32   : > { %vm289_vm1 = vcmp.ge.s32.totalorder %v1075_v10, %v1077_v11  ;;  %v926_v10 = vmov 32.0   ;;  %s592_s12 = sshll.u32 %s231_s22, 4  ;;  %s594_s13 = sshll.u32 %s590_s30, 4  ;;  %s593_s12 = int_to_ptr.vmem [resolvable:$true] %s592_s12  ;;  %s595_s13 = int_to_ptr.hbm [resolvable:$true] %s594_s13 }
  0x33   : > { %259 = vmatpush.msra.mxu0 %v235_v3  ;;  %278 = vmatpush.msra.mxu1 %v238_v16  ;;  %s580_s19 = scalar_lea.sflag [#allocation4], %s1043_s9  ;;  %s862_s21 = sshra.s32 %s595_s13, 4  ;;  %s863_s21 = int_to_ptr.hbm [resolvable:$true] %s862_s21 }
  0x34   : > { %s868_s14 = scalar_lea.hbm %s1163_s4, 16  ;;  %p869_p12 = scmp.lt.s32.totalorder %s863_s21, %s1163_s4 }
  0x35   : > { %260 = vmatpush.msra.mxu0 %v233_v4  ;;  %279 = vmatpush.msra.mxu1 %v236_v17 }
  0x36   : > { %685 = vmatmul.msk.f32.vlgmr.msra.gmra.mxu0 %vm241_vm0, %v1057_v2 }
  0x37   : > { %693 = vmatpush.xpose.msk.msrb.mxu0 %vm241_vm0, %v1057_v2  ;;  %280 = vmatpush.msra.mxu1 %v234_v18 }
  0x38   : > { %686 = vmatmul.msk.f32.vlgmr.msra.gmra.mxu1 %vm241_vm0, %v1057_v2 }
  0xb3   : > { %v262_v5 = vpop.f32.mrf.mxu0 }
  0xb4   : > { %475 = vrot.lane.b32.xlu2 %v262_v5, %s923_s23  ;;  %326 = vrot.lane.b32.xlu0 %v262_v5, %s924_s7 }
  0xb5   : > { %688 = vmatmul.msk.f32.vlgmr.msra.gmra.mxu2 %vm241_vm0, %v262_v5  ;;  %v282_v30 = vpop.f32.mrf.mxu1 }
  0xb6   : > { %407 = vmatpush.msrb.mxu3 %v282_v30 }
  0xbc   : > { %412 = vrot.lane.b32.xlu2 %v262_v5, %s925_s20 }
 0x10e   : > { %v1071_v6 = vpop.permute.xlu2 %475 }
 0x116   : > { %v413_v7 = vpop.permute.xlu2 %412 }
 0x117   : > { %694 = vmatmul.msk.f32.vlgmr.msrb.gmra.mxu0 %vm241_vm0, %v413_v7 }
 0x126   : > { %v327_v8 = vpop.permute.xlu0 %326 }
 0x127   : > { %690 = vmatmul.msk.f32.vlgmr.msra.gmra.mxu3 %vm241_vm0, %v327_v8 }
 0x138   : > { %v310_v12 = vpop.f32.mrf.mxu2 }
 0x139   : > { %v313_v13 = vsel %vm289_vm1, %v310_v12, -inf }
 0x13a   : > { %v315_v14 = vsel %vm314_vm2, %v313_v13, -inf }
 0x13b   : > { %316 = vmax.xlane.f32.xlu2 %v315_v14 }
 0x194   : > { %v433_v22 = vpop.f32.mrf.mxu0 }
 0x195   : > { %v436_v25 = vsel %vm289_vm1, %v433_v22, -inf }
 0x196   : > { %v437_v27 = vsel %vm314_vm2, %v436_v25, -inf }
 0x1aa   : > { %v347_v19 = vpop.f32.mrf.mxu3 }
 0x1ab   : > { %v350_v20 = vsel %vm289_vm1, %v347_v19, -inf }
 0x1ac   : > { %v351_v21 = vsel %vm314_vm2, %v350_v20, -inf }
 0x1ad   : > { %352 = vmax.xlane.f32.xlu0 %v351_v21 }
 0x1ae   : > { %v317_v23 = vpop.xlane.xlu2 %316 }
 0x1af   : > { %v318_v24 = vsub.f32 %v313_v13, %v317_v23 }
 0x1b1   : > { %v319_v26 = vmul.f32 1.442695, %v318_v24 }
 0x1b3   : > { %768 = vpow2.f32 %v319_v26 }
 0x1b5   : > { %438 = vmax.xlane.f32.xlu0 %v437_v27 }
 0x1b9   : > { %v769_v28 = vpop.eup %768 }
 0x1ba   : > { %v321_v29 = vsel %vm314_vm2, %v769_v28, 0.0 }
 0x1bb   : > { %322 = vadd.xlane.f32.xlu2 %v321_v29 }
 0x220   : > { %v353_v31 = vpop.xlane.xlu0 %352 }
 0x221   : > { %v354_v32 = vsub.f32 %v350_v20, %v353_v31 }
 0x223   : > { %v355_v33 = vmul.f32 1.442695, %v354_v32 }
 0x225   : > { %770 = vpow2.f32 %v355_v33  ;;  %v767_v33 = vld [vmem:[%s1162_s3] ss:$0 sm:$0xff] }
 0x228   : > { %v439_v34 = vpop.xlane.xlu0 %438 }
 0x229   : > { %v440_v35 = vsub.f32 %v436_v25, %v439_v34 }
 0x22b   : > { %v771_v36 = vpop.eup %770  ;;  %v441_v37 = vmul.f32 1.442695, %v440_v35 }
 0x22c   : > { %v357_v38 = vsel %vm314_vm2, %v771_v36, 0.0 }
 0x22d   : > { %772 = vpow2.f32 %v441_v37  ;;  %358 = vadd.xlane.f32.xlu1 %v357_v38 }
 0x22e   : > { %v323_v39 = vpop.xlane.xlu2 %322 }
 0x22f   : > { %774 = vrcp.f32 %v323_v39 }
 0x233   : > { %v773_v40 = vpop.eup %772 }
 0x234   : > { %v443_v41 = vsel %vm314_vm2, %v773_v40, 0.0 }
 0x235   : > { %v775_v42 = vpop.eup %774  ;;  %444 = vadd.xlane.f32.xlu2 %v443_v41 }
 0x236   : > { %v325_v43 = vmul.f32 %v775_v42, %v769_v28 }
 0x238   : > { %692 = vmatmul.msk.f32.vlgmr.msrb.gmra.mxu3 %vm314_vm2, %v325_v43 }
 0x246   : > { %363 = vrot.lane.b32.xlu1 %v282_v30, %s924_s7 }
 0x24d   : > { %448 = vrot.lane.b32.xlu2 %v282_v30, %s925_s20 }
 0x2a0   : > { %v359_v45 = vpop.xlane.xlu1 %358 }
 0x2a8   : > { %v445_v44 = vpop.xlane.xlu2 %444 }
 0x2a9   : > { %776 = vrcp.f32 %v445_v44 }
 0x2aa   : > { %778 = vrcp.f32 %v359_v45 }
 0x2af   : > { %v777_v46 = vpop.eup %776 }
 0x2b0   : > { %v449_v47 = vpop.permute.xlu2 %448  ;;  %v447_v48 = vmul.f32 %v777_v46, %v773_v40  ;;  %v779_v49 = vpop.eup %778 }
 0x2b1   : > { %469 = vmatpush.msrb.mxu1 %v449_v47  ;;  %v361_v51 = vmul.f32 %v779_v49, %v771_v36 }
 0x2b2   : > { %695 = vmatmul.msk.f32.vlgmr.msrb.gmra.mxu1 %vm314_vm2, %v447_v48 }
 0x2b8   : > { %v364_v50 = vpop.permute.xlu1 %363 }
 0x2b9   : > { %384 = vmatpush.msrb.mxu2 %v364_v50 }
 0x2ba   : > { %691 = vmatmul.msk.f32.vlgmr.msrb.gmra.mxu2 %vm314_vm2, %v361_v51 }
 0x2bb   : > { %696 = vmatpush.xpose.msk.msra.mxu2 %vm241_vm0, %v1057_v2  ;;  %v409_v1 = vpop.f32.mrf.mxu3 }
 0x2c2   : > { %697 = vmatmul.msk.f32.vlgmr.msra.gmra.mxu2 %vm241_vm0, %v1071_v6 }
 0x32f   : > { %v471_v4 = vpop.f32.mrf.mxu1 }
 0x33d   : > { %v386_v52 = vpop.f32.mrf.mxu2 }
 0x33e   : > { %v410_v3 = vadd.f32 %v409_v1, %v386_v52 }
 0x340   : > { %v474_v5 = vadd.f32 %v471_v4, %v410_v3 }
 0x345   : > { %v496_v53 = vpop.f32.mrf.mxu2 }
 0x346   : > { %v499_v54 = vsel %vm289_vm1, %v496_v53, -inf }
 0x347   : > { %v500_v55 = vsel %vm314_vm2, %v499_v54, -inf }
 0x348   : > { %501 = vmax.xlane.f32.xlu1 %v500_v55 }
 0x3bb   : > { %v502_v56 = vpop.xlane.xlu1 %501 }
 0x3bc   : > { %v503_v57 = vsub.f32 %v499_v54, %v502_v56 }
 0x3be   : > { %v504_v58 = vmul.f32 1.442695, %v503_v57 }
 0x3c0   : > { %780 = vpow2.f32 %v504_v58 }
 0x3c6   : > { %v781_v59 = vpop.eup %780 }
 0x3c7   : > { %v506_v60 = vsel %vm314_vm2, %v781_v59, 0.0 }
 0x3c8   : > { %507 = vadd.xlane.f32.xlu0 %v506_v60 }
 0x3dc   : > { %511 = vrot.lane.b32.xlu0 %v282_v30, %s923_s23  ;;  %v766_v30 = vld [vmem:[%s1161_s2] ss:$0 sm:$0xff]  ;;  %s864_s23 = scalar_lea.hbm %s863_s21, 8 }
 0x3dd   : > { %p865_p1 = scmp.ne.s32.totalorder %s863_s21, %s864_s23  ;;  %p870_p8 = scmp.lt.s32.totalorder %s868_s14, %s864_s23 }
 0x3df   : > { %p866_p3 = pnand %p865_p1, %p1012_p13  ;;  %p871_p7 = por %p870_p8, %p869_p12 }
 0x3e1   : > { %p867_p5 = pneg %p866_p3 }
 0x3e3   : > { %p872_p9 = pnand %p871_p7, %p867_p5 }
 0x43b   : > { %v508_v61 = vpop.xlane.xlu0 %507 }
 0x43c   : > { %782 = vrcp.f32 %v508_v61 }
 0x43d   : > { %784 = vrcp.f32 %v926_v10 }
 0x442   : > { %v783_v62 = vpop.eup %782 }
 0x443   : > { %v510_v63 = vmul.f32 %v783_v62, %v781_v59  ;;  %v785_v11 = vpop.eup %784 }
 0x444   : > { %v543_v12 = vmul.f32 32.0, %v785_v11  ;;  %vm547_vm3 = vweird.f32 %v785_v11 }
 0x446   : > { %v544_v13 = vsub.f32 1.0, %v543_v12 }
 0x448   : > { %v545_v14 = vmul.f32 %v785_v11, %v544_v13 }
 0x44a   : > { %v546_v15 = vadd.f32 %v785_v11, %v545_v14 }
 0x44c   : > { %v548_v16 = vsel %vm547_vm3, %v785_v11, %v546_v15 }
 0x44e   : > { %v512_v0 = vpop.permute.xlu0 %511 }
 0x44f   : > { %532 = vmatpush.msra.mxu3 %v512_v0 }
 0x450   : > { %698 = vmatmul.msk.f32.vlgmr.msra.gmra.mxu3 %vm314_vm2, %v510_v63 }
 0x4d3   : > { %v534_v6 = vpop.f32.mrf.mxu3 }
 0x4d4   : > { %v537_v7 = vadd.f32 %v534_v6, %v474_v5 }
 0x4d6   : > { %v538_v8 = vadd.f32 %v537_v7, %v1057_v2 }
 0x4d8   : > { %v539_v9 = vsel %vm241_vm0, %v538_v8, 0.0 }
 0x4d9   : > { %540 = vadd.xlane.f32.xlu1 %v539_v9 }
 0x54c   : > { %v541_v17 = vpop.xlane.xlu1 %540 }
 0x54d   : > { %v549_v18 = vmul.f32 %v548_v16, %v541_v17 }
 0x54f   : > { %v550_v19 = vsub.f32 %v538_v8, %v549_v18 }
 0x551   : > { %v551_v20 = vmul.f32 %v550_v19, %v550_v19 }
 0x553   : > { %v552_v21 = vsel %vm241_vm0, %v551_v20, 0.0 }
 0x554   : > { %553 = vadd.xlane.f32.xlu1 %v552_v21 }
 0x5c7   : > { %v554_v2 = vpop.xlane.xlu1 %553 }
 0x5c8   : > { %v555_v22 = vmul.f32 %v554_v2, %v548_v16 }
 0x5ca   : > { %v556_v23 = vadd.f32 1e-05, %v555_v22 }
 0x5cc   : > { %786 = vrsqrt.f32 %v556_v23  ;;  %vm563_vm5 = vweird.f32 %v556_v23 }
 0x5d2   : > { %v787_v24 = vpop.eup %786 }
 0x5d3   : > { %v558_v25 = vmul.f32 %v787_v24, %v556_v23  ;;  %vm564_vm4 = vweird.f32 %v787_v24 }
 0x5d4   : > { %vm565_vm6 = vmor %vm563_vm5, %vm564_vm4 }
 0x5d5   : > { %v559_v26 = vmul.f32 %v787_v24, %v558_v25 }
 0x5d7   : > { %v560_v27 = vmul.f32 0.5, %v559_v26 }
 0x5d9   : > { %v561_v28 = vsub.f32 1.5, %v560_v27 }
 0x5db   : > { %v562_v29 = vmul.f32 %v787_v24, %v561_v28 }
 0x5dd   : > { %v566_v31 = vsel %vm565_vm6, %v787_v24, %v562_v29 }
 0x5de   : > { %v567_v32 = vmul.f32 %v566_v31, %v550_v19 }
 0x5e0   : > { %v572_v34 = vmul.f32 %v766_v30, %v567_v32 }
 0x5e2   : > { %v577_v35 = vadd.f32 %v767_v33, %v572_v34 }
 0x5e4   : > { %578 = vst.msk [vmem:[%s231_s22] sm:$0xff] %vm241_vm0, %v577_v35 }
 0x5e5   : > { %875 = shalt.err (!%p872_p9)
}
 0x5e6   : > { %709 = dma.vmem_to_hbm [thread:$0]  (%p1012_p13), %s593_s12, 128, %s595_s13, %s580_s19  }
 0x5e7 PF: > { %s606_s9 = sand.u32 1, %s906_s15   ;;  %p1169_p10 = scmp.ge.s32.totalorder %s918_s18, 2 }
 0x5e8   : > { %s607_s26 = scalar_lea.sflag [#allocation4], %s606_s9 }
 0x5e9   : > { %p720_p11 = pnand %p1169_p10, %p1017_p4 }
 0x5eb   : > { %p721_p0 = pneg %p720_p11 }
 0x5ed   : > { %901 = dma.done.wait (%p721_p0), %s607_s26, 128  }
 0x5ee   : > { %903 = vsyncadd (%p721_p0), %s607_s26, 4294967168  ;;  %p18_p2 = scmp.ge.s32.totalorder %s992_s29, 4   ;;  %s1170_s15 = smov %s910_s16 }
 0x5ef   : > { %s1171_s16 = smov %s914_s17  ;;  %s1172_s17 = smov %s1004_s6 }
 0x5f0   : > { %s1173_s18 = smov %s992_s29  ;;  %20 = sbr.rel (!%p18_p2) target bundleno = 6 (0x6), region = 85 }
 0x5f5   :  { %613 = vsyncpa [#allocation3], 1 }
 0x5f6   :  { %615 = vsyncpa [#allocation3 + $0x1], 1 }
 0x5f7   :  { %616 = vsyncpa [#allocation6], 1 }
 0x5f8   :  { %617 = vsyncpa [#allocation4], 1 }
 0x5f9   :  { %619 = vsyncpa [#allocation4 + $0x1], 1 }

</bundles_post_ra>
